<compile_context>
chip_gen: v7x
topology: tpu7x:2x2x1
jax: 0.10.0
libtpu: 0.0.40
codegen_flags: <defaults>
</compile_context>

<pallas_src>
import functools

import jax
import jax.numpy as jnp
from jax import lax
from jax.experimental import pallas as pl
from jax.experimental.pallas import tpu as pltpu


def _round_up(v, m):
    return (v + m - 1) // m * m


def _sublane_multiple(dtype):
    # f32 -> 8, bf16 -> 16, int8/fp8 -> 32 sublanes per tile.
    return max(8, 32 // jnp.dtype(dtype).itemsize)


def _dice_partial_kernel(x_ref, y_ref, inter_ref, denom_ref, *,
                         hw, tile, num_lane_tiles):
    """Grid: (row_block, lane_tile), both axes "parallel".

    Each grid point writes per-row partial sums into its own (RT, 128) output
    block: column 0 holds sum(x*y) (inter_ref) and sum(x)+sum(y) (denom_ref);
    the remaining lanes are zero.  The wrapper does the tiny final combine.
    """
    xv = x_ref[...].astype(jnp.float32)      # (RT, TILE), f32 accumulate
    yv = y_ref[...].astype(jnp.float32)

    col0 = lax.broadcasted_iota(jnp.int32, inter_ref.shape, 1) == 0

    def emit(xs, ys):
        p_inter = jnp.sum(xs * ys, axis=1, keepdims=True)          # (RT, 1)
        p_denom = (jnp.sum(xs, axis=1, keepdims=True) +
                   jnp.sum(ys, axis=1, keepdims=True))             # (RT, 1)
        inter_ref[...] = jnp.where(col0, p_inter, 0.0)
        denom_ref[...] = jnp.where(col0, p_denom, 0.0)

    if hw % tile != 0:
        # Only the single ragged last lane tile pays the mask; all full tiles
        # take the unmasked fast path.  (Garbage rows from a ragged row block
        # stay confined to their own rows and are sliced away in the wrapper.)
        is_last = pl.program_id(1) == num_lane_tiles - 1

        @pl.when(jnp.logical_not(is_last))
        def _fast():
            emit(xv, yv)

        @pl.when(is_last)
        def _masked():
            lane = ((num_lane_tiles - 1) * tile +
                    lax.broadcasted_iota(jnp.int32, xv.shape, 1))
            valid = (lane < hw).astype(jnp.float32)
            emit(xv * valid, yv * valid)
    else:
        emit(xv, yv)


def dice_coefficient_loss(x, y, *, multiclass=True, apply_softmax=False,
                          eps=1e-6, block_bytes=4 * 1024 * 1024):
    """Pallas implementation of DiceCoefficientLoss.forward."""
    if x.shape != y.shape:
        raise RuntimeError(
            f"Cannot calculate DICE score - input and label size do not match "
            f"({x.shape} vs. {y.shape})")

    in_dtype = x.dtype
    if apply_softmax:
        # torch.softmax(x[:, c, ...], dim=1) for multiclass == softmax over
        # axis=2 of the full NC... tensor; for multiclass=False it is dim=1.
        # Cast back to the input dtype so the kernel streams the original
        # (possibly bf16) width from HBM.
        ax = 2 if multiclass else 1
        x = jax.nn.softmax(x.astype(jnp.float32), axis=ax).astype(in_dtype)

    if multiclass:
        b, c = int(x.shape[0]), int(x.shape[1])
    else:
        b, c = 1, 1
    bc = b * c
    hw = int(x.size) // bc

    # Free row-major reshape: (B, C, spatial...) -> (B*C, HW).
    x2 = x.reshape(bc, hw)
    y2 = y.reshape(bc, hw)

    # --- row tiling ----------------------------------------------------------
    if bc <= 256:
        rt = bc                      # single full-extent row block
        num_row_blocks = 1
    else:
        rt = 256                     # dense multiple of 8/16/32 sublanes
        num_row_blocks = pl.cdiv(bc, rt)

    # --- lane tiling (budget uses the *sublane-padded* footprint) -------------
    bytes_per_lane = max(
        _round_up(rt, _sublane_multiple(x2.dtype)) * jnp.dtype(x2.dtype).itemsize,
        _round_up(rt, _sublane_multiple(y2.dtype)) * jnp.dtype(y2.dtype).itemsize)
    # Bound the in-kernel f32 temporaries (casts / product) as well.
    f32_rows = _round_up(rt, 8)
    max_tile = min(block_bytes // bytes_per_lane,
                   (2 * block_bytes) // (f32_rows * 4))
    max_tile = max(128, (max_tile // 128) * 128)
    tile = min(max_tile, _round_up(hw, 128))
    num_lane_tiles = pl.cdiv(hw, tile)

    kernel = functools.partial(_dice_partial_kernel, hw=hw, tile=tile,
                               num_lane_tiles=num_lane_tiles)

    out_rows = num_row_blocks * rt
    out_cols = num_lane_tiles * 128
    out_sds = jax.ShapeDtypeStruct((out_rows, out_cols), jnp.float32)

    inter_out, denom_out = pl.pallas_call(
        kernel,
        out_shape=(out_sds, out_sds),
        grid=(num_row_blocks, num_lane_tiles),
        in_specs=[pl.BlockSpec((rt, tile), lambda rb, t: (rb, t)),
                  pl.BlockSpec((rt, tile), lambda rb, t: (rb, t))],
        out_specs=(pl.BlockSpec((rt, 128), lambda rb, t: (rb, t)),
                   pl.BlockSpec((rt, 128), lambda rb, t: (rb, t))),
        compiler_params=pltpu.CompilerParams(
            dimension_semantics=("parallel", "parallel"),
            vmem_limit_bytes=48 * 1024 * 1024),
    )(x2, y2)

    # Tiny per-class combine in the wrapper (zeros in unused lanes / padded rows
    # are sliced or summed away).
    inter = inter_out.sum(axis=1)[:bc]
    denom = denom_out.sum(axis=1)[:bc]

    if multiclass:
        inter_c = inter.reshape(b, c).sum(axis=0)        # (C,)
        denom_c = denom.reshape(b, c).sum(axis=0)        # (C,)
        dice = (2.0 * inter_c + eps) / (denom_c + eps)
        return 1.0 - jnp.mean(dice)
    dice = (2.0 * inter[0] + eps) / (denom[0] + eps)
    return 1.0 - dice


def _reference_dice_loss(x, y, eps=1e-6):
    """Pure-JAX reference matching the PyTorch module (multiclass=True)."""
    x = x.astype(jnp.float32)
    y = y.astype(jnp.float32)
    dice = 0.0
    for cls_idx in range(x.shape[1]):
        xc = x[:, cls_idx].reshape(-1)
        yc = y[:, cls_idx].reshape(-1)
        inter = jnp.dot(xc, yc)
        dice += (2.0 * inter + eps) / (xc.sum() + yc.sum() + eps)
    return 1.0 - dice / x.shape[1]


def _reference_dice_loss_single(x, y, eps=1e-6):
    """Pure-JAX reference for multiclass=False."""
    xf = x.astype(jnp.float32).reshape(-1)
    yf = y.astype(jnp.float32).reshape(-1)
    inter = jnp.dot(xf, yf)
    return 1.0 - (2.0 * inter + eps) / (xf.sum() + yf.sum() + eps)


if __name__ == "__main__":
    key = jax.random.PRNGKey(0)
    kx, ky, kx2, ky2 = jax.random.split(key, 4)

    # Case 1: canonical (B, C, H, W) = (2, 4, 16, 16), f32.
    B, C, H, W = 2, 4, 16, 16
    x = jax.random.uniform(kx, (B, C, H, W), dtype=jnp.float32)            # logits
    y = (jax.random.uniform(ky, (B, C, H, W)) > 0.5).astype(jnp.float32)   # labels
    loss = jax.block_until_ready(dice_coefficient_loss(x, y))
    ref = _reference_dice_loss(x, y)
    assert abs(float(loss) - float(ref)) < 1e-5, (float(loss), float(ref))

    # Case 2: ragged spatial extent (exercises the gated in-kernel tail mask).
    x2 = jax.random.uniform(kx2, (2, 3, 10, 10), dtype=jnp.float32)
    y2 = (jax.random.uniform(ky2, (2, 3, 10, 10)) > 0.5).astype(jnp.float32)
    loss2 = jax.block_until_ready(dice_coefficient_loss(x2, y2))
    ref2 = _reference_dice_loss(x2, y2)
    assert abs(float(loss2) - float(ref2)) < 1e-5, (float(loss2), float(ref2))

    # Case 3: bf16 inputs (exercises in-kernel cast; no wrapper upcast pass).
    xb = x.astype(jnp.bfloat16)
    yb = y.astype(jnp.bfloat16)
    loss3 = jax.block_until_ready(dice_coefficient_loss(xb, yb))
    ref3 = _reference_dice_loss(xb, yb)
    assert abs(float(loss3) - float(ref3)) < 1e-4, (float(loss3), float(ref3))

    # Case 4: multiclass=False path (single dice over the whole tensor).
    loss4 = jax.block_until_ready(dice_coefficient_loss(x, y, multiclass=False))
    ref4 = _reference_dice_loss_single(x, y)
    assert abs(float(loss4) - float(ref4)) < 1e-5, (float(loss4), float(ref4))

    print("KERNEL_OK")
</pallas_src>

<mosaic_0001>
module attributes {stable_mosaic.version = 11 : i64} {
  func.func @_dice_partial_kernel(%arg0: i32, %arg1: i32, %arg2: memref<8x256xf32, #tpu.memory_space<vmem>>, %arg3: memref<8x256xf32, #tpu.memory_space<vmem>>, %arg4: memref<8x128xf32, #tpu.memory_space<vmem>>, %arg5: memref<8x128xf32, #tpu.memory_space<vmem>>) attributes {dimension_semantics = [#tpu.dimension_semantics<parallel>, #tpu.dimension_semantics<parallel>], iteration_bounds = array<i64: 1, 1>, scalar_prefetch = 0 : i64, scratch_operands = 0 : i64, tpu.core_type = #tpu.core_type<tc>, window_params = [{transform_indices = @transform_0, window_bounds = array<i64: 8, 256>}, {transform_indices = @transform_1, window_bounds = array<i64: 8, 256>}, {transform_indices = @transform_2, window_bounds = array<i64: 8, 128>}, {transform_indices = @transform_3, window_bounds = array<i64: 8, 128>}]} {
    %c0 = arith.constant 0 : index
    %c0_0 = arith.constant 0 : index
    %0 = vector.load %arg2[%c0, %c0_0] : memref<8x256xf32, #tpu.memory_space<vmem>>, vector<8x256xf32>
    %c0_1 = arith.constant 0 : index
    %c0_2 = arith.constant 0 : index
    %1 = vector.load %arg3[%c0_1, %c0_2] : memref<8x256xf32, #tpu.memory_space<vmem>>, vector<8x256xf32>
    %2 = tpu.iota {dimensions = array<i32: 1>} : vector<8x128xi32>
    %c0_i32 = arith.constant 0 : i32
    %3 = vector.broadcast %c0_i32 : i32 to vector<8x128xi32>
    %4 = arith.cmpi eq, %2, %3 : vector<8x128xi32>
    %5 = arith.mulf %0, %1 : vector<8x256xf32>
    %cst = arith.constant dense<0.000000e+00> : vector<8xf32>
    %6 = vector.multi_reduction <add>, %5, %cst [1] : vector<8x256xf32> to vector<8xf32>
    %7 = vector.shape_cast %6 : vector<8xf32> to vector<8x1xf32>
    %cst_3 = arith.constant dense<0.000000e+00> : vector<8xf32>
    %8 = vector.multi_reduction <add>, %0, %cst_3 [1] : vector<8x256xf32> to vector<8xf32>
    %9 = vector.shape_cast %8 : vector<8xf32> to vector<8x1xf32>
    %cst_4 = arith.constant dense<0.000000e+00> : vector<8xf32>
    %10 = vector.multi_reduction <add>, %1, %cst_4 [1] : vector<8x256xf32> to vector<8xf32>
    %11 = vector.shape_cast %10 : vector<8xf32> to vector<8x1xf32>
    %12 = arith.addf %9, %11 : vector<8x1xf32>
    %cst_5 = arith.constant 0.000000e+00 : f32
    %13 = vector.shape_cast %7 : vector<8x1xf32> to vector<8x1xf32>
    %14 = vector.broadcast %13 : vector<8x1xf32> to vector<8x128xf32>
    %15 = vector.broadcast %cst_5 : f32 to vector<8x128xf32>
    %16 = arith.select %4, %14, %15 : vector<8x128xi1>, vector<8x128xf32>
    %c0_6 = arith.constant 0 : index
    %c0_7 = arith.constant 0 : index
    %17 = vector.load %arg4[%c0_6, %c0_7] : memref<8x128xf32, #tpu.memory_space<vmem>>, vector<8x128xf32>
    tpu.vector_store %arg4[%c0_6, %c0_7], %16 {strides = array<i32>} : memref<8x128xf32, #tpu.memory_space<vmem>>, vector<8x128xf32>,
    %cst_8 = arith.constant 0.000000e+00 : f32
    %18 = vector.shape_cast %12 : vector<8x1xf32> to vector<8x1xf32>
    %19 = vector.broadcast %18 : vector<8x1xf32> to vector<8x128xf32>
    %20 = vector.broadcast %cst_8 : f32 to vector<8x128xf32>
    %21 = arith.select %4, %19, %20 : vector<8x128xi1>, vector<8x128xf32>
    %c0_9 = arith.constant 0 : index
    %c0_10 = arith.constant 0 : index
    %22 = vector.load %arg5[%c0_9, %c0_10] : memref<8x128xf32, #tpu.memory_space<vmem>>, vector<8x128xf32>
    tpu.vector_store %arg5[%c0_9, %c0_10], %21 {strides = array<i32>} : memref<8x128xf32, #tpu.memory_space<vmem>>, vector<8x128xf32>,
    return
  }
  func.func @transform_0(%arg0: i32, %arg1: i32) -> (i32, i32) {
    %c0_i32 = arith.constant 0 : i32
    return %arg0, %arg1 : i32, i32
  }
  func.func @transform_1(%arg0: i32, %arg1: i32) -> (i32, i32) {
    %c0_i32 = arith.constant 0 : i32
    return %arg0, %arg1 : i32, i32
  }
  func.func @transform_2(%arg0: i32, %arg1: i32) -> (i32, i32) {
    %c0_i32 = arith.constant 0 : i32
    return %arg0, %arg1 : i32, i32
  }
  func.func @transform_3(%arg0: i32, %arg1: i32) -> (i32, i32) {
    %c0_i32 = arith.constant 0 : i32
    return %arg0, %arg1 : i32, i32
  }
}

</mosaic_0001>

<bundles_post_ra>
// kernel: tpu_custom_call.1
= control target key start
LH: loop header
LB: loop body
LE: loop exit
PB: predicated region body
PF: predicated region fallthrough
CT: control target
= control target key end

     0   :  { %9 = vsyncpa [#allocation3], 0  ;;  %s266_s0 = inlined_call_operand.hbm [shape: f32[8,256], index: 0, kind: input, shape index: {}]   ;;  %s267_s1 = inlined_call_operand.hbm [shape: f32[8,256], index: 1, kind: input, shape index: {}]   ;;  %s268_s2 = inlined_call_operand.hbm [shape: f32[8,128], index: 2, kind: output, shape index: {0}]   ;;  %s269_s3 = inlined_call_operand.hbm [shape: f32[8,128], index: 3, kind: output, shape index: {1}]  }
   0x1   :  { %10 = vsyncpa [#allocation6], 0 }
   0x2   :  { %11 = vsyncpa [#allocation4], 0 }
   0x3   :  { %12 = vsyncpa [#allocation9], 0  ;;  %s192_s12 = smov [#allocation2]   ;;  %s193_s14 = smov [#allocation5]  }
   0x4   :  { %s19_s13 = sshll.u32 %s192_s12, 4  ;;  %s29_s15 = sshll.u32 %s193_s14, 4  ;;  %s20_s13 = int_to_ptr.vmem [resolvable:$true] %s19_s13  ;;  %s30_s15 = int_to_ptr.vmem [resolvable:$true] %s29_s15 }
   0x5   :  { %s96_s18 = scalar_lea.hbm %s266_s0, 256 }
   0x6   :  { %p97_p0 = scmp.ne.s32.totalorder %s266_s0, %s96_s18  ;;  %p100_p1 = scmp.lt.u32.totalorder %s96_s18, %s266_s0 }
   0x8   :  { %p102_p2 = pnand %p100_p1, %p97_p0 }
   0xa   :  { %105 = shalt.err (!%p102_p2)
}
   0xb   :  { %s106_s23 = scalar_lea.vmem %s20_s13, 256  ;;  %p111_p4 = scmp.lt.s32.totalorder %s20_s13, %s20_s13 }
   0xc   :  { %p107_p3 = scmp.ne.s32.totalorder %s20_s13, %s106_s23  ;;  %p112_p5 = scmp.lt.s32.totalorder %s106_s23, %s106_s23 }
   0xe   :  { %p113_p6 = por %p112_p5, %p111_p4 }
  0x10   :  { %p114_p7 = pnand %p113_p6, %p107_p3 }
  0x12   :  { %117 = shalt.err (!%p114_p7)
}
  0x13   :  { %22 = dma.hbm_to_vmem [thread:$0]  %s266_s0, 256, %s20_s13, [#allocation3]  }
  0x14   :  { %s118_s28 = scalar_lea.hbm %s267_s1, 256 }
  0x15   :  { %p119_p8 = scmp.ne.s32.totalorder %s267_s1, %s118_s28  ;;  %p122_p9 = scmp.lt.u32.totalorder %s118_s28, %s267_s1 }
  0x17   :  { %p124_p10 = pnand %p122_p9, %p119_p8 }
  0x19   :  { %127 = shalt.err (!%p124_p10)
}
  0x1a   :  { %s128_s6 = scalar_lea.vmem %s30_s15, 256  ;;  %p133_p12 = scmp.lt.s32.totalorder %s30_s15, %s30_s15 }
  0x1b   :  { %p129_p11 = scmp.ne.s32.totalorder %s30_s15, %s128_s6  ;;  %p134_p13 = scmp.lt.s32.totalorder %s128_s6, %s128_s6 }
  0x1d   :  { %p135_p0 = por %p134_p13, %p133_p12 }
  0x1f   :  { %p136_p1 = pnand %p135_p0, %p129_p11 }
  0x21   :  { %139 = shalt.err (!%p136_p1)
}
  0x22   :  { %32 = dma.hbm_to_vmem [thread:$0]  %s267_s1, 256, %s30_s15, [#allocation6]  }
  0x23   :  { %184 = dma.done.wait [#allocation3], 256  }
  0x24   :  { %185 = vsyncadd [#allocation3], 4294967040 }
  0x25   :  { %186 = dma.done.wait [#allocation6], 256  }
  0x26   :  { %187 = vsyncadd [#allocation6], 4294967040  ;;  %v39_v0 = vld [vmem:[#allocation2] sm:$0xff]  ;;  %v40_v1 = vld [vmem:[#allocation2 + $0x8] sm:$0xff]  ;;  %v43_v9 = vlaneseq  ;;  %s194_s1 = smov [#allocation7]   ;;  %s195_s9 = smov [#allocation8]  }
  0x27   :  { %v41_v2 = vld [vmem:[#allocation5] sm:$0xff]  ;;  %v51_v3 = vadd.f32 %v40_v1, %v39_v0  ;;  %v42_v4 = vld [vmem:[#allocation5 + $0x8] sm:$0xff]  ;;  %s68_s8 = sshll.u32 %s194_s1, 4  ;;  %s78_s10 = sshll.u32 %s195_s9, 4  ;;  %s69_s8 = int_to_ptr.vmem [resolvable:$true] %s68_s8  ;;  %s79_s10 = int_to_ptr.vmem [resolvable:$true] %s78_s10 }
  0x28   :  { %v46_v5 = vmul.f32 %v41_v2, %v39_v0  ;;  %v47_v6 = vmul.f32 %v42_v4, %v40_v1  ;;  %v54_v7 = vadd.f32 %v42_v4, %v41_v2  ;;  %v44_v10 = vand.u32 127, %v43_v9  ;;  %s140_s11 = scalar_lea.vmem %s69_s8, 128  ;;  %p145_p3 = scmp.lt.s32.totalorder %s69_s8, %s69_s8 }
  0x29   :  { %52 = vadd.xlane.f32.xlu0 %v51_v3  ;;  %p141_p2 = scmp.ne.s32.totalorder %s69_s8, %s140_s11  ;;  %p146_p4 = scmp.lt.s32.totalorder %s140_s11, %s140_s11 }
  0x2a   :  { %v48_v8 = vadd.f32 %v47_v6, %v46_v5  ;;  %vm45_vm0 = vcmp.eq.s32.totalorder %v44_v10, 0 }
  0x2b   :  { %p147_p5 = por %p146_p4, %p145_p3 }
  0x2c   :  { %49 = vadd.xlane.f32.xlu1 %v48_v8 }
  0x2d   :  { %55 = vadd.xlane.f32.xlu0 %v54_v7  ;;  %p148_p6 = pnand %p147_p5, %p141_p2 }
  0xb6   :  { %v53_v11 = vpop.xlane.xlu0 %52 }
  0xb9   :  { %v50_v12 = vpop.xlane.xlu1 %49 }
  0xba   :  { %v56_v13 = vpop.xlane.xlu0 %55  ;;  %v58_v14 = vsel %vm45_vm0, %v50_v12, 0.0 }
  0xbb   :  { %v57_v15 = vadd.f32 %v56_v13, %v53_v11  ;;  %59 = vst [vmem:[#allocation7] sm:$0xff] %v58_v14 }
  0xbc   :  { %151 = shalt.err (!%p148_p6)
}
  0xbd   :  { %s152_s14 = scalar_lea.hbm %s268_s2, 128 }
  0xbe   :  { %p153_p7 = scmp.ne.s32.totalorder %s268_s2, %s152_s14  ;;  %p156_p8 = scmp.lt.u32.totalorder %s152_s14, %s268_s2 }
  0xc0   :  { %p158_p9 = pnand %p156_p8, %p153_p7 }
  0xc2   :  { %161 = shalt.err (!%p158_p9)
}
  0xc3   :  { %71 = dma.vmem_to_hbm [thread:$0]  %s69_s8, 128, %s268_s2, [#allocation4]   ;;  %v60_v16 = vsel %vm45_vm0, %v57_v15, 0.0 }
  0xc4   :  { %61 = vst [vmem:[#allocation8] sm:$0xff] %v60_v16  ;;  %s162_s21 = scalar_lea.vmem %s79_s10, 128  ;;  %p167_p11 = scmp.lt.s32.totalorder %s79_s10, %s79_s10 }
  0xc5   :  { %p163_p10 = scmp.ne.s32.totalorder %s79_s10, %s162_s21  ;;  %p168_p12 = scmp.lt.s32.totalorder %s162_s21, %s162_s21 }
  0xc7   :  { %p169_p13 = por %p168_p12, %p167_p11 }
  0xc9   :  { %p170_p0 = pnand %p169_p13, %p163_p10 }
  0xcb   :  { %173 = shalt.err (!%p170_p0)
}
  0xcc   :  { %s174_s24 = scalar_lea.hbm %s269_s3, 128 }
  0xcd   :  { %p175_p1 = scmp.ne.s32.totalorder %s269_s3, %s174_s24  ;;  %p178_p2 = scmp.lt.u32.totalorder %s174_s24, %s269_s3 }
  0xcf   :  { %p180_p3 = pnand %p178_p2, %p175_p1 }
  0xd1   :  { %183 = shalt.err (!%p180_p3)
}
  0xd2   :  { %81 = dma.vmem_to_hbm [thread:$0]  %s79_s10, 128, %s269_s3, [#allocation9]  }
  0xd3   :  { %188 = dma.done.wait [#allocation4], 128  }
  0xd4   :  { %189 = vsyncadd [#allocation4], 4294967168 }
  0xd5   :  { %190 = dma.done.wait [#allocation9], 128  }
  0xd6   :  { %191 = vsyncadd [#allocation9], 4294967168 }
  0xd7   :  { %88 = vsyncpa [#allocation3], 1 }
  0xd8   :  { %89 = vsyncpa [#allocation6], 1 }
  0xd9   :  { %90 = vsyncpa [#allocation4], 1 }
  0xda   :  { %91 = vsyncpa [#allocation9], 1 }

</bundles_post_ra>
